<compile_context>
chip_gen: v5e
topology: v5e:2x2
jax: 0.10.0
libtpu: 0.0.40
codegen_flags: <defaults>
</compile_context>

<pallas_src>
import math

import jax
import jax.numpy as jnp
from jax import lax
from jax.experimental import pallas as pl
from jax.experimental.pallas import tpu as pltpu

N_DIM = 128
N_HEADS = 8
INF = 10 ** 8


def decoder_mha_kernel(h_ref, hc_ref, mask_ref, mbias_ref,
                       qw_ref, qb_ref, vkfw_ref, vkfb_ref,
                       wf_ref, bf_ref, ones_ref,
                       out_ref):
    # Per-grid-step block shapes:
    #   h_ref     : (B, C, E)   f32   encoder states
    #   hc_ref    : (B, 3E)     f32   concat(h_N, h_prev, h_0)
    #   mask_ref  : (B, C)      f32   0/1 mask, row (lane) layout
    #   mbias_ref : (B, C, E)   bf16  -INF*mask pre-broadcast to lane width
    #   weights   : grid-invariant bf16 (biases f32)
    #   out_ref   : (B, C)      f32
    B, C, E = h_ref.shape

    # bf16 cast happens in VMEM (no HBM round trip).  Reshape while still f32
    # so the (B,C,E)->(B*C,E) flatten is layout-preserving (C % 8 == 0).
    h_flat = h_ref[...].reshape(B * C, E).astype(jnp.bfloat16)
    hc_bf = hc_ref[...].astype(jnp.bfloat16)

    # ---- Projections: bf16 MXU operands, f32 accumulation. ----
    q = jnp.dot(hc_bf, qw_ref[...],
                preferred_element_type=jnp.float32) + qb_ref[...]            # (B, E)
    vkf = jnp.dot(h_flat, vkfw_ref[...],
                  preferred_element_type=jnp.float32) + vkfb_ref[...]        # (B*C, 2E)
    v3 = vkf[:, :E].reshape(B, C, E)                                         # V(h)
    kf3 = vkf[:, E:].reshape(B, C, E)                                        # Kf(h)

    # ---- Head attention scores at full 128-lane width. ----
    # ones_ref = per-head block-diagonal indicator with 1/sqrt(eh) folded in,
    # so scores[b,c,e] == <q_head(e), v_head(e)[c]> / sqrt(eh) replicated on
    # every lane e belonging to that head.
    qv = (v3 * q[:, None, :]).reshape(B * C, E).astype(jnp.bfloat16)
    scores = jnp.dot(qv, ones_ref[...],
                     preferred_element_type=jnp.float32).reshape(B, C, E)
    scores = scores + mbias_ref[...].astype(jnp.float32)                     # -INF * mask

    # Per-head softmax over the city axis (value identical across a head's lanes).
    m = jnp.max(scores, axis=1, keepdims=True)
    ex = jnp.exp(scores - m)
    denom = jnp.sum(ex, axis=1, keepdims=True)
    p = ex * pl.reciprocal(denom, approx=True)                               # (B, C, E)

    context = jnp.sum(p * v3, axis=1)                                        # (B, E)

    # ---- Fused Wo -> Qf (1/sqrt(E) pre-folded), then pointer scores. ----
    qf = jnp.dot(context.astype(jnp.bfloat16), wf_ref[...],
                 preferred_element_type=jnp.float32) + bf_ref[...]           # (B, E)
    dots = jnp.sum(kf3 * qf[:, None, :], axis=-1)                            # (B, C)
    out_ref[...] = 10.0 * jnp.tanh(dots) - mask_ref[...] * INF


def _choose_b_tile(batch, city_p):
    """Batch tile so each grid step feeds ~2048 rows to the MXU GEMMs
    (amortizes the ~0.35us/step pipeline overhead), keeps 2-D (b_tile, city)
    blocks legal (sublane dim multiple of 16 unless the block spans the whole
    batch), and keeps >= 2 grid steps when the batch allows it so the
    "parallel" axis can shard across v7x's two TensorCores."""
    target_rows = 2048
    bt = max(1, target_rows // max(city_p, 1))
    if bt >= batch:
        if batch >= 32:
            half = (batch + 1) // 2
            return ((half + 15) // 16) * 16      # 2 parallel steps
        return batch                             # single step: block == array
    return max(16, (bt // 16) * 16)


def prepare_params(params):
    """One-time weight prep (keep out of the per-call path): fusions, scale
    folding, bf16 casts, and the per-head block-diagonal indicator."""
    E = params['Vw'].shape[0]
    eh = E // N_HEADS
    s = 1.0 / math.sqrt(E)
    # Fuse Wo -> Qf and fold the 1/sqrt(E) pointer-score scale.
    wf = (params['Wow'] @ params['Qfw']) * s
    bf = (params['Wob'] @ params['Qfw'] + params['Qfb']) * s
    # Fuse V || Kf into a single (E, 2E) GEMM.
    vkfw = jnp.concatenate([params['Vw'], params['Kfw']], axis=1)
    vkfb = jnp.concatenate([params['Vb'], params['Kfb']], axis=1)
    # Per-head block-diagonal indicator with 1/sqrt(eh) folded in
    # (0 / 0.25 values are exact in bf16 for power-of-two head dims).
    idx = jnp.arange(E)
    ones_block = ((idx[:, None] // eh) == (idx[None, :] // eh)).astype(jnp.float32)
    ones_block = ones_block * (1.0 / math.sqrt(eh))
    return {
        'qw': params['Qw'].astype(jnp.bfloat16),
        'qb': params['Qb'].astype(jnp.float32),
        'vkfw': vkfw.astype(jnp.bfloat16),
        'vkfb': vkfb.astype(jnp.float32),
        'wf': wf.astype(jnp.bfloat16),
        'bf': bf.astype(jnp.float32),
        'ones': ones_block.astype(jnp.bfloat16),
    }


@jax.jit
def decoder_mha(h, h_N, h_prev, h_0, mask, prepared):
    batch, city, embed = h.shape
    assert embed % N_HEADS == 0

    hc = jnp.concatenate([h_N, h_prev, h_0], axis=2).reshape(batch, 3 * embed)
    mask = mask.astype(jnp.float32)

    # Pad city to a multiple of 8 (padded cities hard-masked) so in-kernel
    # (B, city, E) <-> (B*city, E) reshapes are layout-preserving.
    city_add = (-city) % 8
    if city_add:
        h = jnp.pad(h, ((0, 0), (0, city_add), (0, 0)))
        mask = jnp.pad(mask, ((0, 0), (0, city_add)), constant_values=1.0)
    city_p = city + city_add

    b_tile = _choose_b_tile(batch, city_p)
    b_add = (-batch) % b_tile
    if b_add:
        h = jnp.pad(h, ((0, b_add), (0, 0), (0, 0)))
        hc = jnp.pad(hc, ((0, b_add), (0, 0)))
        mask = jnp.pad(mask, ((0, b_add), (0, 0)))
    bpad = batch + b_add
    grid = (bpad // b_tile,)

    # Dense, lane-wide additive softmax mask (-INF on masked cities), bf16.
    mask_bias = lax.broadcast_in_dim(
        (mask * (-float(INF))).astype(jnp.bfloat16), (bpad, city_p, embed), (0, 1))

    def full_spec(x):
        zeros = (0,) * x.ndim
        return pl.BlockSpec(x.shape, lambda b, _z=zeros: _z)

    grid_spec = pltpu.PrefetchScalarGridSpec(
        num_scalar_prefetch=0,
        grid=grid,
        in_specs=[
            pl.BlockSpec((b_tile, city_p, embed), lambda b: (b, 0, 0)),   # h (f32)
            pl.BlockSpec((b_tile, 3 * embed), lambda b: (b, 0)),          # h_c (f32)
            pl.BlockSpec((b_tile, city_p), lambda b: (b, 0)),             # mask, row layout
            pl.BlockSpec((b_tile, city_p, embed), lambda b: (b, 0, 0)),   # -INF*mask, lane-wide bf16
            full_spec(prepared['qw']), full_spec(prepared['qb']),
            full_spec(prepared['vkfw']), full_spec(prepared['vkfb']),
            full_spec(prepared['wf']), full_spec(prepared['bf']),
            full_spec(prepared['ones']),
        ],
        out_specs=pl.BlockSpec((b_tile, city_p), lambda b: (b, 0)),
    )

    out = pl.pallas_call(
        decoder_mha_kernel,
        out_shape=jax.ShapeDtypeStruct((bpad, city_p), jnp.float32),
        grid_spec=grid_spec,
        # VMEM use (~13 MiB at the largest tile) stays under the 32 MiB scoped
        # default on v5e/v6e/v7x, so no explicit vmem_limit_bytes needed.
        compiler_params=pltpu.CompilerParams(dimension_semantics=("parallel",)),
    )(h, hc, mask, mask_bias,
      prepared['qw'], prepared['qb'], prepared['vkfw'], prepared['vkfb'],
      prepared['wf'], prepared['bf'], prepared['ones'])

    # torch .squeeze() on (batch, 1, city) -> (batch, city)
    return out[:batch, :city]


def decoder_mha_ref(h, h_N, h_prev, h_0, mask, params):
    """Pure-JAX f32 reference mirroring the PyTorch forward (incl. the k_h := v bug)."""
    batch, city, embed = h.shape
    heads = N_HEADS
    eh = embed // heads
    hc = jnp.concatenate([h_N, h_prev, h_0], axis=2)
    q = hc @ params['Qw'] + params['Qb']
    v = h @ params['Vw'] + params['Vb']
    q_h = q.reshape(batch, 1, heads, eh).transpose(0, 2, 1, 3)       # (b,H,1,eh)
    v_h = v.reshape(batch, city, heads, eh).transpose(0, 2, 1, 3)    # (b,H,city,eh)
    dot = jnp.einsum('bhqe,bhce->bhqc', q_h, v_h) / math.sqrt(eh)
    dot = dot - mask[:, None, None, :] * INF
    p = jax.nn.softmax(dot, axis=-1)
    ctx = jnp.einsum('bhqc,bhce->bhqe', p, v_h)
    ctx = ctx.transpose(0, 2, 1, 3).reshape(batch, 1, embed)
    dec_out = ctx @ params['Wow'] + params['Wob']
    qf = dec_out @ params['Qfw'] + params['Qfb']
    kf = h @ params['Kfw'] + params['Kfb']
    d = jnp.einsum('bqe,bce->bqc', qf, kf).reshape(batch, city) / math.sqrt(embed)
    d = 10.0 * jnp.tanh(d)
    return d - mask * INF


def init_params(key, n_dim=N_DIM):
    ks = jax.random.split(key, 12)

    def w(k, shape):
        return (jax.random.normal(k, shape, jnp.float32) * 0.02).astype(jnp.float32)

    return {
        'Kw':  w(ks[0], (n_dim, n_dim)),      'Kb':  w(ks[1], (1, n_dim)),  # unused (original bug)
        'Qw':  w(ks[2], (3 * n_dim, n_dim)),  'Qb':  w(ks[3], (1, n_dim)),
        'Vw':  w(ks[4], (n_dim, n_dim)),      'Vb':  w(ks[5], (1, n_dim)),
        'Wow': w(ks[6], (n_dim, n_dim)),      'Wob': w(ks[7], (1, n_dim)),
        'Qfw': w(ks[8], (n_dim, n_dim)),      'Qfb': w(ks[9], (1, n_dim)),
        'Kfw': w(ks[10], (n_dim, n_dim)),     'Kfb': w(ks[11], (1, n_dim)),
    }


if __name__ == "__main__":
    key = jax.random.PRNGKey(0)
    k_param, k_h, k_prev, k_0, k_mask = jax.random.split(key, 5)

    batch, city, embed = 2, 16, N_DIM
    params = init_params(k_param, embed)
    prepared = prepare_params(params)                                  # one-time weight prep

    h = jax.random.normal(k_h, (batch, city, embed), jnp.float32)
    h_N = jnp.mean(h, axis=1, keepdims=True)                           # (batch,1,embed)
    h_prev = jax.random.normal(k_prev, (batch, 1, embed), jnp.float32)
    h_0 = jax.random.normal(k_0, (batch, 1, embed), jnp.float32)
    mask = (jax.random.uniform(k_mask, (batch, city)) < 0.3).astype(jnp.float32)

    out = decoder_mha(h, h_N, h_prev, h_0, mask, prepared)
    out = jax.block_until_ready(out)

    ref = decoder_mha_ref(h, h_N, h_prev, h_0, mask, params)
    assert out.shape == (batch, city)
    assert jnp.allclose(out, ref, rtol=2e-2, atol=2e-2), "mismatch vs reference"

    print("KERNEL_OK")
</pallas_src>

<mosaic_0001>
module attributes {stable_mosaic.version = 11 : i64} {
  func.func @decoder_mha_kernel(%arg0: i32, %arg1: memref<2x16x128xf32, #tpu.memory_space<vmem>>, %arg2: memref<2x384xf32, #tpu.memory_space<vmem>>, %arg3: memref<2x16xf32, #tpu.memory_space<vmem>>, %arg4: memref<2x16x128xbf16, #tpu.memory_space<vmem>>, %arg5: memref<384x128xbf16, #tpu.memory_space<vmem>>, %arg6: memref<1x128xf32, #tpu.memory_space<vmem>>, %arg7: memref<128x256xbf16, #tpu.memory_space<vmem>>, %arg8: memref<1x256xf32, #tpu.memory_space<vmem>>, %arg9: memref<128x128xbf16, #tpu.memory_space<vmem>>, %arg10: memref<1x128xf32, #tpu.memory_space<vmem>>, %arg11: memref<128x128xbf16, #tpu.memory_space<vmem>>, %arg12: memref<2x16xf32, #tpu.memory_space<vmem>>) attributes {dimension_semantics = [#tpu.dimension_semantics<parallel>], iteration_bounds = array<i64: 1>, scalar_prefetch = 0 : i64, scratch_operands = 0 : i64, tpu.core_type = #tpu.core_type<tc>, window_params = [{transform_indices = @transform_0, window_bounds = array<i64: 2, 16, 128>}, {transform_indices = @transform_1, window_bounds = array<i64: 2, 384>}, {transform_indices = @transform_2, window_bounds = array<i64: 2, 16>}, {transform_indices = @transform_3, window_bounds = array<i64: 2, 16, 128>}, {pipeline_mode = #tpu.pipeline_mode<synchronous>, transform_indices = @transform_4, window_bounds = array<i64: 384, 128>}, {pipeline_mode = #tpu.pipeline_mode<synchronous>, transform_indices = @transform_5, window_bounds = array<i64: 1, 128>}, {pipeline_mode = #tpu.pipeline_mode<synchronous>, transform_indices = @transform_6, window_bounds = array<i64: 128, 256>}, {pipeline_mode = #tpu.pipeline_mode<synchronous>, transform_indices = @transform_7, window_bounds = array<i64: 1, 256>}, {pipeline_mode = #tpu.pipeline_mode<synchronous>, transform_indices = @transform_8, window_bounds = array<i64: 128, 128>}, {pipeline_mode = #tpu.pipeline_mode<synchronous>, transform_indices = @transform_9, window_bounds = array<i64: 1, 128>}, {pipeline_mode = #tpu.pipeline_mode<synchronous>, transform_indices = @transform_10, window_bounds = array<i64: 128, 128>}, {transform_indices = @transform_11, window_bounds = array<i64: 2, 16>}]} {
    %c0 = arith.constant 0 : index
    %c0_0 = arith.constant 0 : index
    %c0_1 = arith.constant 0 : index
    %0 = vector.load %arg1[%c0, %c0_0, %c0_1] : memref<2x16x128xf32, #tpu.memory_space<vmem>>, vector<2x16x128xf32>
    %1 = vector.shape_cast %0 : vector<2x16x128xf32> to vector<32x128xf32>
    %2 = arith.truncf %1 : vector<32x128xf32> to vector<32x128xbf16>
    %c0_2 = arith.constant 0 : index
    %c0_3 = arith.constant 0 : index
    %3 = vector.load %arg2[%c0_2, %c0_3] : memref<2x384xf32, #tpu.memory_space<vmem>>, vector<2x384xf32>
    %4 = arith.truncf %3 : vector<2x384xf32> to vector<2x384xbf16>
    %c0_4 = arith.constant 0 : index
    %c0_5 = arith.constant 0 : index
    %5 = vector.load %arg5[%c0_4, %c0_5] : memref<384x128xbf16, #tpu.memory_space<vmem>>, vector<384x128xbf16>
    %cst = arith.constant dense<0.000000e+00> : vector<2x128xf32>
    %6 = tpu.matmul %4, %5, %cst {dimension_numbers = #tpu.dot_dimension_numbers<[1], [0], [0], [1], [0, 0, 1, 1], [], []>} : vector<2x384xbf16>, vector<384x128xbf16>, vector<2x128xf32> -> vector<2x128xf32>
    %c0_6 = arith.constant 0 : index
    %c0_7 = arith.constant 0 : index
    %7 = vector.load %arg6[%c0_6, %c0_7] : memref<1x128xf32, #tpu.memory_space<vmem>>, vector<1x128xf32>
    %8 = vector.broadcast %7 : vector<1x128xf32> to vector<2x128xf32>
    %9 = arith.addf %6, %8 : vector<2x128xf32>
    %c0_8 = arith.constant 0 : index
    %c0_9 = arith.constant 0 : index
    %10 = vector.load %arg7[%c0_8, %c0_9] : memref<128x256xbf16, #tpu.memory_space<vmem>>, vector<128x256xbf16>
    %cst_10 = arith.constant dense<0.000000e+00> : vector<32x256xf32>
    %11 = tpu.matmul %2, %10, %cst_10 {dimension_numbers = #tpu.dot_dimension_numbers<[1], [0], [0], [1], [0, 0, 1, 1], [], []>} : vector<32x128xbf16>, vector<128x256xbf16>, vector<32x256xf32> -> vector<32x256xf32>
    %c0_11 = arith.constant 0 : index
    %c0_12 = arith.constant 0 : index
    %12 = vector.load %arg8[%c0_11, %c0_12] : memref<1x256xf32, #tpu.memory_space<vmem>>, vector<1x256xf32>
    %13 = vector.broadcast %12 : vector<1x256xf32> to vector<32x256xf32>
    %14 = arith.addf %11, %13 : vector<32x256xf32>
    %15 = vector.extract_strided_slice %14 {offsets = [0, 0], sizes = [32, 128], strides = [1, 1]} : vector<32x256xf32> to vector<32x128xf32>
    %16 = vector.shape_cast %15 : vector<32x128xf32> to vector<2x16x128xf32>
    %17 = vector.extract_strided_slice %14 {offsets = [0, 128], sizes = [32, 128], strides = [1, 1]} : vector<32x256xf32> to vector<32x128xf32>
    %18 = vector.shape_cast %17 : vector<32x128xf32> to vector<2x16x128xf32>
    %19 = vector.shape_cast %9 : vector<2x128xf32> to vector<2x1x128xf32>
    %20 = vector.broadcast %19 : vector<2x1x128xf32> to vector<2x16x128xf32>
    %21 = arith.mulf %16, %20 : vector<2x16x128xf32>
    %22 = vector.shape_cast %21 : vector<2x16x128xf32> to vector<32x128xf32>
    %23 = arith.truncf %22 : vector<32x128xf32> to vector<32x128xbf16>
    %c0_13 = arith.constant 0 : index
    %c0_14 = arith.constant 0 : index
    %24 = vector.load %arg11[%c0_13, %c0_14] : memref<128x128xbf16, #tpu.memory_space<vmem>>, vector<128x128xbf16>
    %cst_15 = arith.constant dense<0.000000e+00> : vector<32x128xf32>
    %25 = tpu.matmul %23, %24, %cst_15 {dimension_numbers = #tpu.dot_dimension_numbers<[1], [0], [0], [1], [0, 0, 1, 1], [], []>} : vector<32x128xbf16>, vector<128x128xbf16>, vector<32x128xf32> -> vector<32x128xf32>
    %26 = vector.shape_cast %25 : vector<32x128xf32> to vector<2x16x128xf32>
    %c0_16 = arith.constant 0 : index
    %c0_17 = arith.constant 0 : index
    %c0_18 = arith.constant 0 : index
    %27 = vector.load %arg4[%c0_16, %c0_17, %c0_18] : memref<2x16x128xbf16, #tpu.memory_space<vmem>>, vector<2x16x128xbf16>
    %28 = arith.extf %27 : vector<2x16x128xbf16> to vector<2x16x128xf32>
    %29 = arith.addf %26, %28 : vector<2x16x128xf32>
    %cst_19 = arith.constant dense<0xFF800000> : vector<2x128xf32>
    %30 = vector.multi_reduction <maximumf>, %29, %cst_19 [1] : vector<2x16x128xf32> to vector<2x128xf32>
    %31 = vector.shape_cast %30 : vector<2x128xf32> to vector<2x1x128xf32>
    %32 = vector.broadcast %31 : vector<2x1x128xf32> to vector<2x16x128xf32>
    %33 = arith.subf %29, %32 : vector<2x16x128xf32>
    %34 = math.exp %33 : vector<2x16x128xf32>
    %cst_20 = arith.constant dense<0.000000e+00> : vector<2x128xf32>
    %35 = vector.multi_reduction <add>, %34, %cst_20 [1] : vector<2x16x128xf32> to vector<2x128xf32>
    %36 = vector.shape_cast %35 : vector<2x128xf32> to vector<2x1x128xf32>
    %37 = tpu.reciprocal %36 {approx = true} : vector<2x1x128xf32> -> vector<2x1x128xf32>
    %38 = vector.broadcast %37 : vector<2x1x128xf32> to vector<2x16x128xf32>
    %39 = arith.mulf %34, %38 : vector<2x16x128xf32>
    %40 = arith.mulf %39, %16 : vector<2x16x128xf32>
    %cst_21 = arith.constant dense<0.000000e+00> : vector<2x128xf32>
    %41 = vector.multi_reduction <add>, %40, %cst_21 [1] : vector<2x16x128xf32> to vector<2x128xf32>
    %42 = arith.truncf %41 : vector<2x128xf32> to vector<2x128xbf16>
    %c0_22 = arith.constant 0 : index
    %c0_23 = arith.constant 0 : index
    %43 = vector.load %arg9[%c0_22, %c0_23] : memref<128x128xbf16, #tpu.memory_space<vmem>>, vector<128x128xbf16>
    %cst_24 = arith.constant dense<0.000000e+00> : vector<2x128xf32>
    %44 = tpu.matmul %42, %43, %cst_24 {dimension_numbers = #tpu.dot_dimension_numbers<[1], [0], [0], [1], [0, 0, 1, 1], [], []>} : vector<2x128xbf16>, vector<128x128xbf16>, vector<2x128xf32> -> vector<2x128xf32>
    %c0_25 = arith.constant 0 : index
    %c0_26 = arith.constant 0 : index
    %45 = vector.load %arg10[%c0_25, %c0_26] : memref<1x128xf32, #tpu.memory_space<vmem>>, vector<1x128xf32>
    %46 = vector.broadcast %45 : vector<1x128xf32> to vector<2x128xf32>
    %47 = arith.addf %44, %46 : vector<2x128xf32>
    %48 = vector.shape_cast %47 : vector<2x128xf32> to vector<2x1x128xf32>
    %49 = vector.broadcast %48 : vector<2x1x128xf32> to vector<2x16x128xf32>
    %50 = arith.mulf %18, %49 : vector<2x16x128xf32>
    %cst_27 = arith.constant dense<0.000000e+00> : vector<2x16xf32>
    %51 = vector.multi_reduction <add>, %50, %cst_27 [2] : vector<2x16x128xf32> to vector<2x16xf32>
    %52 = math.tanh %51 : vector<2x16xf32>
    %cst_28 = arith.constant 1.000000e+01 : f32
    %53 = vector.broadcast %cst_28 : f32 to vector<2x16xf32>
    %54 = arith.mulf %53, %52 : vector<2x16xf32>
    %c0_29 = arith.constant 0 : index
    %c0_30 = arith.constant 0 : index
    %55 = vector.load %arg3[%c0_29, %c0_30] : memref<2x16xf32, #tpu.memory_space<vmem>>, vector<2x16xf32>
    %cst_31 = arith.constant 1.000000e+08 : f32
    %56 = vector.broadcast %cst_31 : f32 to vector<2x16xf32>
    %57 = arith.mulf %55, %56 : vector<2x16xf32>
    %58 = arith.subf %54, %57 : vector<2x16xf32>
    %c0_32 = arith.constant 0 : index
    %c0_33 = arith.constant 0 : index
    %59 = vector.load %arg12[%c0_32, %c0_33] : memref<2x16xf32, #tpu.memory_space<vmem>>, vector<2x16xf32>
    tpu.vector_store %arg12[%c0_32, %c0_33], %58 {strides = array<i32>} : memref<2x16xf32, #tpu.memory_space<vmem>>, vector<2x16xf32>,
    return
  }
  func.func @transform_0(%arg0: i32) -> (i32, i32, i32) {
    %c0_i32 = arith.constant 0 : i32
    %c0_i32_0 = arith.constant 0 : i32
    %c0_i32_1 = arith.constant 0 : i32
    return %arg0, %c0_i32, %c0_i32_0 : i32, i32, i32
  }
  func.func @transform_1(%arg0: i32) -> (i32, i32) {
    %c0_i32 = arith.constant 0 : i32
    %c0_i32_0 = arith.constant 0 : i32
    return %arg0, %c0_i32 : i32, i32
  }
  func.func @transform_2(%arg0: i32) -> (i32, i32) {
    %c0_i32 = arith.constant 0 : i32
    %c0_i32_0 = arith.constant 0 : i32
    return %arg0, %c0_i32 : i32, i32
  }
  func.func @transform_3(%arg0: i32) -> (i32, i32, i32) {
    %c0_i32 = arith.constant 0 : i32
    %c0_i32_0 = arith.constant 0 : i32
    %c0_i32_1 = arith.constant 0 : i32
    return %arg0, %c0_i32, %c0_i32_0 : i32, i32, i32
  }
  func.func @transform_4(%arg0: i32) -> (i32, i32) {
    %c0_i32 = arith.constant 0 : i32
    %c0_i32_0 = arith.constant 0 : i32
    %c0_i32_1 = arith.constant 0 : i32
    return %c0_i32, %c0_i32_0 : i32, i32
  }
  func.func @transform_5(%arg0: i32) -> (i32, i32) {
    %c0_i32 = arith.constant 0 : i32
    %c0_i32_0 = arith.constant 0 : i32
    %c0_i32_1 = arith.constant 0 : i32
    return %c0_i32, %c0_i32_0 : i32, i32
  }
  func.func @transform_6(%arg0: i32) -> (i32, i32) {
    %c0_i32 = arith.constant 0 : i32
    %c0_i32_0 = arith.constant 0 : i32
    %c0_i32_1 = arith.constant 0 : i32
    return %c0_i32, %c0_i32_0 : i32, i32
  }
  func.func @transform_7(%arg0: i32) -> (i32, i32) {
    %c0_i32 = arith.constant 0 : i32
    %c0_i32_0 = arith.constant 0 : i32
    %c0_i32_1 = arith.constant 0 : i32
    return %c0_i32, %c0_i32_0 : i32, i32
  }
  func.func @transform_8(%arg0: i32) -> (i32, i32) {
    %c0_i32 = arith.constant 0 : i32
    %c0_i32_0 = arith.constant 0 : i32
    %c0_i32_1 = arith.constant 0 : i32
    return %c0_i32, %c0_i32_0 : i32, i32
  }
  func.func @transform_9(%arg0: i32) -> (i32, i32) {
    %c0_i32 = arith.constant 0 : i32
    %c0_i32_0 = arith.constant 0 : i32
    %c0_i32_1 = arith.constant 0 : i32
    return %c0_i32, %c0_i32_0 : i32, i32
  }
  func.func @transform_10(%arg0: i32) -> (i32, i32) {
    %c0_i32 = arith.constant 0 : i32
    %c0_i32_0 = arith.constant 0 : i32
    %c0_i32_1 = arith.constant 0 : i32
    return %c0_i32, %c0_i32_0 : i32, i32
  }
  func.func @transform_11(%arg0: i32) -> (i32, i32) {
    %c0_i32 = arith.constant 0 : i32
    %c0_i32_0 = arith.constant 0 : i32
    return %arg0, %c0_i32 : i32, i32
  }
}

</mosaic_0001>

<bundles_post_ra>
// kernel: decoder_mha.1
= control target key start
LH: loop header
LB: loop body
LE: loop exit
PB: predicated region body
PF: predicated region fallthrough
CT: control target
= control target key end

     0   :  { %16 = vsyncpa [#allocation3], 0  ;;  %s1531_s0 = inlined_call_operand.hbm [shape: f32[2,16,128], index: 0, kind: input, shape index: {}]   ;;  %s1532_s1 = inlined_call_operand.vmem [shape: f32[2,384], index: 1, kind: input, shape index: {}]   ;;  %s1533_s2 = inlined_call_operand.vmem [shape: f32[2,16], index: 2, kind: input, shape index: {}]   ;;  %s1534_s3 = inlined_call_operand.vmem [shape: bf16[2,16,128], index: 3, kind: input, shape index: {}]   ;;  %s1535_s4 = inlined_call_operand.hbm [shape: bf16[384,128], index: 4, kind: input, shape index: {}]   ;;  %s1536_s5 = inlined_call_operand.vmem [shape: f32[1,128], index: 5, kind: input, shape index: {}]   ;;  %s1537_s6 = inlined_call_operand.hbm [shape: bf16[128,256], index: 6, kind: input, shape index: {}]   ;;  %s1538_s7 = inlined_call_operand.vmem [shape: f32[1,256], index: 7, kind: input, shape index: {}]   ;;  %s1539_s8 = inlined_call_operand.hbm [shape: bf16[128,128], index: 8, kind: input, shape index: {}]   ;;  %s1540_s9 = inlined_call_operand.vmem [shape: f32[1,128], index: 9, kind: input, shape index: {}]   ;;  %s1541_s10 = inlined_call_operand.hbm [shape: bf16[128,128], index: 10, kind: input, shape index: {}]   ;;  %s1542_s11 = inlined_call_operand.hbm [shape: f32[2,16], index: 11, kind: output, shape index: {}]  }
   0x1   :  { %17 = vsyncpa [#allocation6], 0 }
   0x2   :  { %18 = vsyncpa [#allocation9], 0  ;;  %s43_s19 = sshll.u32 %s1535_s4, 4  ;;  %s44_s19 = int_to_ptr.hbm [resolvable:$true] %s43_s19 }
   0x3   :  { %19 = vsyncpa [#allocation4], 0  ;;  %s1372_s20 = smov [#allocation5]   ;;  %s73_s24 = sshll.u32 %s1539_s8, 4  ;;  %s74_s24 = int_to_ptr.hbm [resolvable:$true] %s73_s24 }
   0x4   :  { %s45_s21 = sshll.u32 %s1372_s20, 4  ;;  %s1373_s25 = smov 64   ;;  %s46_s21 = int_to_ptr.vmem [resolvable:$true] %s45_s21 }
   0x5   :  { %s1374_s26 = smov 4   ;;  %s1375_s27 = smov [#allocation8]  }
   0x6   :  { %51 = dma.hbm_to_vmem [thread:$0]  %s44_s19, 3072, %s46_s21, [#allocation6], %s1373_s25, %s1373_s25, %s1374_s26  }
   0x7   :  { %s75_s28 = sshll.u32 %s1375_s27, 4  ;;  %s24_s30 = sshll.u32 %s1531_s0, 4  ;;  %s76_s28 = int_to_ptr.vmem [resolvable:$true] %s75_s28  ;;  %s25_s30 = int_to_ptr.hbm [resolvable:$true] %s24_s30 }
   0x8   :  { %81 = dma.hbm_to_vmem [thread:$0]  %s74_s24, 1024, %s76_s28, [#allocation9], %s1373_s25, %s1373_s25, %s1374_s26  }
   0x9   :  { %s1376_s8 = smov [#allocation2]   ;;  %s58_s15 = sshll.u32 %s1537_s6, 4  ;;  %s59_s15 = int_to_ptr.hbm [resolvable:$true] %s58_s15 }
   0xa   :  { %s26_s12 = sshll.u32 %s1376_s8, 4  ;;  %s1377_s16 = smov 128   ;;  %s27_s12 = int_to_ptr.vmem [resolvable:$true] %s26_s12 }
   0xb   :  { %s1378_s17 = smov 8   ;;  %s1379_s18 = smov [#allocation7]  }
   0xc   :  { %32 = dma.hbm_to_vmem [thread:$0]  %s25_s30, 512, %s27_s12, [#allocation3], %s1377_s16, %s1377_s16, %s1378_s17  }
   0xd   :  { %s60_s19 = sshll.u32 %s1379_s18, 4  ;;  %s88_s21 = sshll.u32 %s1541_s10, 4  ;;  %s61_s19 = int_to_ptr.vmem [resolvable:$true] %s60_s19  ;;  %s89_s21 = int_to_ptr.hbm [resolvable:$true] %s88_s21 }
   0xe   :  { %66 = dma.hbm_to_vmem [thread:$0]  %s59_s15, 2048, %s61_s19, [#allocation6], %s1377_s16, %s1377_s16, %s1378_s17  }
   0xf   :  { %s1380_s22 = smov [#allocation10]  }
  0x10   :  { %s90_s23 = sshll.u32 %s1380_s22, 4  ;;  %s91_s23 = int_to_ptr.vmem [resolvable:$true] %s90_s23 }
  0x11   :  { %96 = dma.hbm_to_vmem [thread:$0]  %s89_s21, 1024, %s91_s23, [#allocation9], %s1373_s25, %s1373_s25, %s1374_s26  }
  0x12   :  { %1364 = dma.done.wait [#allocation3], 512  }
  0x13   :  { %1365 = vsyncadd [#allocation3], 4294966784 }
  0x14   :  { %1366 = dma.done.wait [#allocation6], 5120  }
  0x15   :  { %1367 = vsyncadd [#allocation6], 4294962176 }
  0x16   :  { %1368 = dma.done.wait [#allocation9], 2048  }
  0x17   :  { %1369 = vsyncadd [#allocation9], 4294965248  ;;  %v1115_v0 = vld [vmem:[#allocation5 + $0x38] sm:$0xff]  ;;  %v1038_v2 = vld [vmem:[#allocation7 + $0x70] sm:$0xf]  ;;  %vm707_vm0 = vcmask 1041409  }
  0x18   :  { %v1131_v1 = vld [vmem:[#allocation5 + $0xb8] sm:$0xff]  ;;  %v1114_v5 = vld [vmem:[#allocation5 + $0x30] sm:$0xff]  ;;  %331 = vmatpush.bf16.msra.mxu0 %v1115_v0  ;;  %v1030_v8 = vld [vmem:[#allocation7 + $0x60] sm:$0xf]  ;;  %vm856_vm1 = vcmask 130112   ;;  %s872_s13 = sshll.u32 %s1542_s11, 4  ;;  %s873_s13 = int_to_ptr.hbm [resolvable:$true] %s872_s13 }
  0x19   :  { %v1147_v3 = vld [vmem:[#allocation7 + $0x74] sm:$0xf0]  ;;  %357 = vmatpush.bf16.msra.mxu2 %v1131_v1  ;;  %v1130_v7 = vld [vmem:[#allocation5 + $0xb0] sm:$0xff]  ;;  %v1145_v9 = vld [vmem:[#allocation7 + $0x64] sm:$0xf0]  ;;  %vm863_vm2 = vcmask 123904  }
  0x1a   :  { %v1123_v4 = vld [vmem:[#allocation5 + $0x78] sm:$0xff]  ;;  %v1039_v6 = vor.u32 %v1147_v3, %v1038_v2  ;;  %v1122_v10 = vld [vmem:[#allocation5 + $0x70] sm:$0xff]  ;;  %v1031_v11 = vor.u32 %v1145_v9, %v1030_v8  ;;  %v1113_v14 = vld [vmem:[#allocation5 + $0x28] sm:$0xff] }
  0x1b   :  { %344 = vmatpush.bf16.msra.mxu1 %v1123_v4  ;;  %v1022_v12 = vld [vmem:[#allocation7 + $0x50] sm:$0xf]  ;;  %v1143_v13 = vld [vmem:[#allocation7 + $0x54] sm:$0xf0]  ;;  %v1129_v15 = vld [vmem:[#allocation5 + $0xa8] sm:$0xff] }
  0x1c   :  { %472 = vmatpush.bf16.msra.mxu3 %v1039_v6  ;;  %332 = vmatpush.bf16.msra.mxu0 %v1114_v5  ;;  %v1121_v16 = vld [vmem:[#allocation5 + $0x68] sm:$0xff]  ;;  %v1023_v17 = vor.u32 %v1143_v13, %v1022_v12  ;;  %v1014_v18 = vld [vmem:[#allocation7 + $0x40] sm:$0xf]  ;;  %v1006_v24 = vld [vmem:[#allocation7 + $0x30] sm:$0xf] }
  0x1d   :  { %358 = vmatpush.bf16.msra.mxu2 %v1130_v7  ;;  %v1141_v19 = vld [vmem:[#allocation7 + $0x44] sm:$0xf0]  ;;  %v1112_v20 = vld [vmem:[#allocation5 + $0x20] sm:$0xff]  ;;  %v1139_v25 = vld [vmem:[#allocation7 + $0x34] sm:$0xf0] }
  0x1e   :  { %v1128_v21 = vld [vmem:[#allocation5 + $0xa0] sm:$0xff]  ;;  %v1015_v23 = vor.u32 %v1141_v19, %v1014_v18  ;;  %v123_v26 = vld [vmem:[%s1532_s1] sm:$0x3f]  ;;  %v1007_v30 = vor.u32 %v1139_v25, %v1006_v24  ;;  %v1137_v32 = vld [vmem:[#allocation7 + $0x24] sm:$0xf0] }
  0x1f   :  { %345 = vmatpush.bf16.msra.mxu1 %v1122_v10  ;;  %v1120_v22 = vld [vmem:[#allocation5 + $0x60] sm:$0xff]  ;;  %v1111_v27 = vld [vmem:[#allocation5 + $0x18] sm:$0xff]  ;;  %125 = vst [vmem:[#allocation1] ss:$4 sm:$0xff] %v123_v26  ;;  %v1110_v33 = vld [vmem:[#allocation5 + $0x10] sm:$0xff] }
  0x20   :  { %473 = vmatpush.bf16.msra.mxu3 %v1031_v11  ;;  %333 = vmatpush.bf16.msra.mxu0 %v1113_v14  ;;  %v1127_v28 = vld [vmem:[#allocation5 + $0x98] sm:$0xff]  ;;  %v998_v31 = vld [vmem:[#allocation7 + $0x20] sm:$0xf]  ;;  %v1126_v34 = vld [vmem:[#allocation5 + $0x90] sm:$0xff] }
  0x21   :  { %359 = vmatpush.bf16.msra.mxu2 %v1129_v15  ;;  %v1119_v29 = vld [vmem:[#allocation5 + $0x58] sm:$0xff]  ;;  %v1118_v35 = vld [vmem:[#allocation5 + $0x50] sm:$0xff]  ;;  %v999_v36 = vor.u32 %v1137_v32, %v998_v31  ;;  %v1109_v39 = vld [vmem:[#allocation5 + $0x8] sm:$0xff] }
  0x22   :  { %v990_v37 = vld [vmem:[#allocation7 + $0x10] sm:$0xf]  ;;  %v1135_v38 = vld [vmem:[#allocation7 + $0x14] sm:$0xf0]  ;;  %v1125_v40 = vld [vmem:[#allocation5 + $0x88] sm:$0xff] }
  0x23   :  { %346 = vmatpush.bf16.msra.mxu1 %v1121_v16  ;;  %v1117_v41 = vld [vmem:[#allocation5 + $0x48] sm:$0xff]  ;;  %v991_v42 = vor.u32 %v1135_v38, %v990_v37  ;;  %v1108_v43 = vld [vmem:[#allocation5] sm:$0xff]  ;;  %v1155_v54 = vld [vmem:[#allocation10 + $0x38] sm:$0xff] }
  0x24   :  { %474 = vmatpush.bf16.msra.mxu3 %v1023_v17  ;;  %334 = vmatpush.bf16.msra.mxu0 %v1112_v20  ;;  %v1124_v44 = vld [vmem:[#allocation5 + $0x80] sm:$0xff]  ;;  %v1133_v46 = vld [vmem:[#allocation7 + $0x4] sm:$0xf0]  ;;  %v1154_v59 = vld [vmem:[#allocation10 + $0x30] sm:$0xff] }
  0x25   :  { %360 = vmatpush.bf16.msra.mxu2 %v1128_v21  ;;  %v982_v45 = vld [vmem:[#allocation7] sm:$0xf]  ;;  %v118_v53 = vld [vmem:[#allocation2 + $0x8] sm:$0xff]  ;;  %v119_v61 = vld [vmem:[#allocation2 + $0x10] sm:$0xff] }
  0x26   :  { %v126_v47 = vld.sshfl [vmem:[#allocation1] sm:$0xff pattern:$0x73625140]  ;;  %v128_v48 = vld.sshfl [vmem:[#allocation1 + $0x10] sm:$0xff pattern:$0x73625140]  ;;  %v983_v51 = vor.u32 %v1133_v46, %v982_v45 }
  0x27   :  { %347 = vmatpush.bf16.msra.mxu1 %v1120_v22  ;;  %v1116_v49 = vld [vmem:[#allocation5 + $0x40] sm:$0xff]  ;;  %v132_v55 = vpack.c.bf16 %v126_v47, %v126_v47  ;;  %v134_v56 = vpack.c.bf16 %v128_v48, %v128_v48  ;;  %v1153_v60 = vld [vmem:[#allocation10 + $0x28] sm:$0xff]  ;;  %v120_v62 = vld [vmem:[#allocation2 + $0x18] sm:$0xff] }
  0x28   :  { %475 = vmatpush.bf16.msra.mxu3 %v1015_v23  ;;  %335 = vmatpush.bf16.msra.mxu0 %v1111_v27  ;;  %v127_v50 = vld.sshfl [vmem:[#allocation1 + $0x8] sm:$0xff pattern:$0x73625140]  ;;  %v1473_v63 = vpack.c.bf16 %v120_v62, %v119_v61  ;;  %v1151_v1 = vld [vmem:[#allocation10 + $0x18] sm:$0xff]  ;;  %v1150_v2 = vld [vmem:[#allocation10 + $0x10] sm:$0xff] }
  0x29   :  { %361 = vmatpush.bf16.msra.mxu2 %v1127_v28  ;;  %v117_v52 = vld [vmem:[#allocation2] sm:$0xff]  ;;  %v133_v57 = vpack.c.bf16 %v127_v50, %v127_v50  ;;  %v1149_v3 = vld [vmem:[#allocation10 + $0x8] sm:$0xff]  ;;  %v1198_v5 = vld [vmem:[%s1536_s5] ss:$0 sm:$0xff] }
  0x2a   :  { %v1470_v58 = vpack.c.bf16 %v118_v53, %v117_v52  ;;  %v1152_v0 = vld [vmem:[#allocation10 + $0x20] sm:$0xff]  ;;  %v1482_v11 = vld [vmem:[%s1538_s7] sm:$0x3]  ;;  %v1146_v62 = vld [vmem:[#allocation7 + $0x74] sm:$0xf] }
  0x2b   :  { %348 = vmatpush.bf16.msra.mxu1 %v1119_v29  ;;  %v1148_v4 = vld [vmem:[#allocation10] sm:$0xff]  ;;  %v388_v16 = vperm.slane %v1482_v11, 0 }
  0x2c   :  { %476 = vmatpush.bf16.msra.mxu3 %v1007_v30  ;;  %336 = vmatpush.bf16.msra.mxu0 %v1110_v33  ;;  %v1172_v46 = vld [vmem:[%s1534_s3 + $0x8] sm:$0xff]  }
  0x2d   :  { %362 = vmatpush.bf16.msra.mxu2 %v1126_v34  ;;  %v1171_v50 = vunpack.c.h.bf16 %v1172_v46 }
  0x2f   :  { %349 = vmatpush.bf16.msra.mxu1 %v1118_v35  ;;  %v1165_v35 = vld [vmem:[%s1534_s3] sm:$0xff]  }
  0x30   :  { %477 = vmatpush.bf16.msra.mxu3 %v999_v36  ;;  %337 = vmatpush.bf16.msra.mxu0 %v1109_v39  ;;  %v1166_v36 = vunpack.c.l.bf16 %v1165_v35  ;;  %v1167_v37 = vunpack.c.h.bf16 %v1165_v35  ;;  %v1138_v35 = vld [vmem:[#allocation7 + $0x34] sm:$0xf] }
  0x31   :  { %363 = vmatpush.bf16.msra.mxu2 %v1125_v40 }
  0x33   :  { %350 = vmatpush.bf16.msra.mxu1 %v1117_v41 }
  0x34   :  { %478 = vmatpush.bf16.msra.mxu3 %v991_v42  ;;  %338 = vmatpush.bf16.msra.mxu0 %v1108_v43 }
  0x35   :  { %364 = vmatpush.bf16.msra.mxu2 %v1124_v44 }
  0x37   :  { %351 = vmatpush.bf16.msra.mxu1 %v1116_v49  ;;  %339 = vmatmul.bf16.vlgmr.msra.gmra.mxu0 %v132_v55  ;;  %v1170_v49 = vunpack.c.l.bf16 %v1172_v46  ;;  %v992_v46 = vld [vmem:[#allocation7 + $0x18] sm:$0xf0] }
  0x38   :  { %479 = vmatpush.bf16.msra.mxu3 %v983_v51  ;;  %365 = vmatmul.bf16.vlgmr.msra.gmra.mxu2 %v134_v56 }
  0x3a   :  { %352 = vmatmul.bf16.vlgmr.msra.gmra.mxu1 %v133_v57 }
  0x3b   :  { %586 = vmatpush.bf16.msrb.mxu1 %v1155_v54  ;;  %480 = vmatmul.bf16.vlgmr.msra.gmra.mxu3 %v1470_v58 }
  0x3f   :  { %587 = vmatpush.bf16.msrb.mxu1 %v1154_v59 }
  0x43   :  { %588 = vmatpush.bf16.msrb.mxu1 %v1153_v60 }
  0x47   :  { %589 = vmatpush.bf16.msrb.mxu1 %v1152_v0  ;;  %v1040_v0 = vld [vmem:[#allocation7 + $0x78] sm:$0xf0] }
  0x4b   :  { %485 = vmatmul.bf16.gmra.mxu3 %v1473_v63  ;;  %590 = vmatpush.bf16.msrb.mxu1 %v1151_v1  ;;  %v1043_v1 = vor.u32 %v1146_v62, %v1040_v0 }
  0x4d   :  { %1173 = vmatpush.bf16.msrb.mxu3 %v1043_v1  ;;  %491 = vmatpush.bf16.msrb.mxu0 %v1043_v1 }
  0x4f   :  { %591 = vmatpush.bf16.msrb.mxu1 %v1150_v2 }
  0x53   :  { %592 = vmatpush.bf16.msrb.mxu1 %v1149_v3 }
  0x57   :  { %593 = vmatpush.bf16.msrb.mxu1 %v1148_v4  ;;  %v1144_v4 = vld [vmem:[#allocation7 + $0x64] sm:$0xf] }
  0xb4   :  { %v340_v6 = vpop.f32.mrf.mxu0 }
  0xb5   :  { %v341_v8 = vadd.f32 %v1198_v5, %v340_v6  ;;  %v1032_v5 = vld [vmem:[#allocation7 + $0x68] sm:$0xf0] }
  0xb6   :  { %v1035_v6 = vor.u32 %v1144_v4, %v1032_v5 }
  0xb7   :  { %v353_v7 = vpop.f32.mrf.mxu1 }
  0xb8   :  { %v354_v10 = vadd.f32 %v353_v7, %v341_v8  ;;  %v1163_v7 = vld [vmem:[#allocation8 + $0x38] sm:$0xff]  ;;  %1174 = vmatpush.bf16.msrb.mxu3 %v1035_v6  ;;  %492 = vmatpush.bf16.msrb.mxu0 %v1035_v6 }
  0xb9   :  { %759 = vmatpush.bf16.msrb.mxu2 %v1163_v7 }
  0xbb   :  { %v366_v9 = vpop.f32.mrf.mxu2 }
  0xbc   :  { %v342_v13 = vpop.f32.mrf.mxu0  ;;  %v367_v15 = vadd.f32 %v366_v9, %v354_v10 }
  0xbe   :  { %v481_v12 = vpop.f32.mrf.mxu3  ;;  %v512_v18 = vperm.slane %v367_v15, 0  ;;  %v511_v26 = vrot.slane %v367_v15, 1  ;;  %v1024_v15 = vld [vmem:[#allocation7 + $0x58] sm:$0xf0] }
  0xbf   :  { %v355_v14 = vpop.f32.mrf.mxu1  ;;  %v1485_v19 = vadd.f32 %v481_v12, %v388_v16 }
  0xc0   :  { %v513_v29 = vperm.slane %v511_v26, 0  ;;  %v1142_v14 = vld [vmem:[#allocation7 + $0x54] sm:$0xf]  ;;  %v1016_v26 = vld [vmem:[#allocation7 + $0x48] sm:$0xf0] }
  0xc1   :  { %v516_v22 = vmul.f32 %v512_v18, %v1485_v19 }
  0xc3   :  { %v368_v17 = vpop.f32.mrf.mxu2 }
  0xc4   :  { %v1162_v17 = vld [vmem:[#allocation8 + $0x30] sm:$0xff] }
  0xc5   :  { %760 = vmatpush.bf16.msrb.mxu2 %v1162_v17 }
  0xc6   :  { %v483_v20 = vpop.f32.mrf.mxu3 }
  0xc7   :  { %v1487_v21 = vadd.f32 %v483_v20, %v388_v16 }
  0xc9   :  { %v517_v23 = vmul.f32 %v512_v18, %v1487_v21 }
  0xcb   :  { %v520_v24 = vpack.c.bf16 %v517_v23, %v516_v22 }
  0xcd   :  { %594 = vmatmul.bf16.vlgmr.msrb.gmra.mxu1 %v520_v24 }
  0xce   :  { %v486_v25 = vpop.f32.mrf.mxu3 }
  0xcf   :  { %v1491_v27 = vadd.f32 %v486_v25, %v388_v16  ;;  %v1140_v25 = vld [vmem:[#allocation7 + $0x44] sm:$0xf] }
  0xd1   :  { %v518_v31 = vmul.f32 %v513_v29, %v1491_v27 }
  0xd6   :  { %v488_v28 = vpop.f32.mrf.mxu3 }
  0xd7   :  { %v1493_v30 = vadd.f32 %v488_v28, %v388_v16  ;;  %v1027_v16 = vor.u32 %v1142_v14, %v1024_v15  ;;  %v1019_v28 = vor.u32 %v1140_v25, %v1016_v26 }
  0xd9   :  { %v519_v32 = vmul.f32 %v513_v29, %v1493_v30  ;;  %1175 = vmatpush.bf16.msrb.mxu3 %v1027_v16  ;;  %493 = vmatpush.bf16.msrb.mxu0 %v1027_v16  ;;  %v1161_v29 = vld [vmem:[#allocation8 + $0x28] sm:$0xff] }
  0xda   :  { %761 = vmatpush.bf16.msrb.mxu2 %v1161_v29 }
  0xdb   :  { %v521_v33 = vpack.c.bf16 %v519_v32, %v518_v31 }
  0xdd   :  { %599 = vmatmul.bf16.gmra.mxu1 %v521_v33  ;;  %1176 = vmatpush.bf16.msrb.mxu3 %v1019_v28 }
  0xde   :  { %494 = vmatpush.bf16.msrb.mxu0 %v1019_v28 }
 0x14a   :  { %v595_v34 = vpop.f32.mrf.mxu1 }
 0x14b   :  { %v613_v39 = vadd.f32 %v1166_v36, %v595_v34  ;;  %v1008_v36 = vld [vmem:[#allocation7 + $0x38] sm:$0xf0] }
 0x152   :  { %v597_v38 = vpop.f32.mrf.mxu1 }
 0x153   :  { %v614_v40 = vadd.f32 %v1167_v37, %v597_v38  ;;  %v1011_v37 = vor.u32 %v1138_v35, %v1008_v36  ;;  %v1160_v38 = vld [vmem:[#allocation8 + $0x20] sm:$0xff] }
 0x154   :  { %762 = vmatpush.bf16.msrb.mxu2 %v1160_v38  ;;  %v1199_v38 = vld [vmem:[%s1540_s9] ss:$0 sm:$0xff] }
 0x155   :  { %v617_v41 = vmax.f32 %v613_v39, %v614_v40  ;;  %1177 = vmatpush.bf16.msrb.mxu3 %v1011_v37  ;;  %495 = vmatpush.bf16.msrb.mxu0 %v1011_v37  ;;  %v389_v37 = vperm.slane %v1482_v11, 1 }
 0x157   :  { %v618_v42 = vrot.slane %v617_v41, 4 }
 0x159   :  { %v619_v43 = vmax.f32 %v617_v41, %v618_v42 }
 0x15a   :  { %v600_v44 = vpop.f32.mrf.mxu1 }
 0x15b   :  { %v620_v45 = vrot.slane %v619_v43, 2  ;;  %v615_v55 = vadd.f32 %v1170_v49, %v600_v44 }
 0x15d   :  { %v621_v47 = vmax.f32 %v619_v43, %v620_v45  ;;  %v1159_v43 = vld [vmem:[#allocation8 + $0x18] sm:$0xff]  ;;  %v1134_v45 = vld [vmem:[#allocation7 + $0x14] sm:$0xf] }
 0x15e   :  { %763 = vmatpush.bf16.msrb.mxu2 %v1159_v43  ;;  %v995_v49 = vor.u32 %v1134_v45, %v992_v46 }
 0x15f   :  { %v622_v48 = vrot.slane %v621_v47, 1 }
 0x161   :  { %v623_v51 = vmax.f32 %v621_v47, %v622_v48 }
 0x162   :  { %v602_v52 = vpop.f32.mrf.mxu1 }
 0x163   :  { %v631_v53 = vsub.f32 %v613_v39, %v623_v51  ;;  %v632_v54 = vsub.f32 %v614_v40, %v623_v51  ;;  %v616_v56 = vadd.f32 %v1171_v50, %v602_v52  ;;  %v1136_v39 = vld [vmem:[#allocation7 + $0x24] sm:$0xf]  ;;  %v1000_v40 = vld [vmem:[#allocation7 + $0x28] sm:$0xf0]  ;;  %v1158_v50 = vld [vmem:[#allocation8 + $0x10] sm:$0xff] }
 0x164   :  { %v1003_v42 = vor.u32 %v1136_v39, %v1000_v40  ;;  %v1132_v52 = vld [vmem:[#allocation7 + $0x4] sm:$0xf]  ;;  %764 = vmatpush.bf16.msrb.mxu2 %v1158_v50 }
 0x165   :  { %v635_v57 = vmul.f32 1.442695, %v631_v53  ;;  %v637_v59 = vmul.f32 1.442695, %v632_v54  ;;  %v624_v60 = vmax.f32 %v615_v55, %v616_v56  ;;  %v984_v53 = vld [vmem:[#allocation7 + $0x8] sm:$0xf0] }
 0x166   :  { %1178 = vmatpush.bf16.msrb.mxu3 %v1003_v42  ;;  %496 = vmatpush.bf16.msrb.mxu0 %v1003_v42 }
 0x167   :  { %1200 = vpow2.f32 %v635_v57  ;;  %v625_v61 = vrot.slane %v624_v60, 4 }
 0x168   :  { %1202 = vpow2.f32 %v637_v59 }
 0x169   :  { %v626_v2 = vmax.f32 %v624_v60, %v625_v61 }
 0x16a   :  { %1179 = vmatpush.bf16.msrb.mxu3 %v995_v49  ;;  %497 = vmatpush.bf16.msrb.mxu0 %v995_v49 }
 0x16b   :  { %v627_v3 = vrot.slane %v626_v2, 2 }
 0x16d   :  { %v1503_v8 = vpop.eup %1200  ;;  %v628_v9 = vmax.f32 %v626_v2, %v627_v3  ;;  %v1156_v2 = vld [vmem:[#allocation8] sm:$0xff] }
 0x16e   :  { %v1505_v10 = vpop.eup %1202 }
 0x16f   :  { %v643_v12 = vadd.f32 %v1505_v10, %v1503_v8  ;;  %v629_v13 = vrot.slane %v628_v9, 1 }
 0x171   :  { %v644_v18 = vrot.slane %v643_v12, 4  ;;  %v630_v20 = vmax.f32 %v628_v9, %v629_v13 }
 0x173   :  { %v645_v22 = vadd.f32 %v644_v18, %v643_v12  ;;  %v633_v23 = vsub.f32 %v615_v55, %v630_v20  ;;  %v634_v24 = vsub.f32 %v616_v56, %v630_v20  ;;  %v987_v55 = vor.u32 %v1132_v52, %v984_v53  ;;  %v1157_v56 = vld [vmem:[#allocation8 + $0x8] sm:$0xff] }
 0x174   :  { %765 = vmatpush.bf16.msrb.mxu2 %v1157_v56  ;;  %v1381_v56 = vmov 0  }
 0x175   :  { %v646_v31 = vrot.slane %v645_v22, 2  ;;  %v639_v32 = vmul.f32 1.442695, %v633_v23  ;;  %v641_v33 = vmul.f32 1.442695, %v634_v24  ;;  %1180 = vmatpush.bf16.msrb.mxu3 %v987_v55  ;;  %498 = vmatpush.bf16.msrb.mxu0 %v987_v55 }
 0x177   :  { %v647_v34 = vadd.f32 %v646_v31, %v645_v22  ;;  %1204 = vpow2.f32 %v639_v32  ;;  %v798_v31 = vld [vmem:[%s1533_s2] sm:$0x3]  ;;  %s1382_s2 = smov [#allocation11]  }
 0x178   :  { %1206 = vpow2.f32 %v641_v33  ;;  %504 = vmatmul.bf16.vlgmr.msrb.gmra.mxu3 %v1473_v63  ;;  %766 = vmatpush.bf16.msrb.mxu2 %v1156_v2  ;;  %v799_v33 = vmul.f32 1e+08, %v798_v31  ;;  %s870_s9 = sshll.u32 %s1382_s2, 4  ;;  %s871_s9 = int_to_ptr.vmem [resolvable:$true] %s870_s9 }
 0x179   :  { %v648_v41 = vrot.slane %v647_v34, 1  ;;  %499 = vmatmul.bf16.vlgmr.msrb.gmra.mxu0 %v1470_v58 }
 0x17a   :  { %v801_v35 = vperm.slane %v799_v33, 0  ;;  %v814_v55 = vperm.slane %v799_v33, 1 }
 0x17b   :  { %v649_v44 = vadd.f32 %v648_v41, %v647_v34 }
 0x17d   :  { %v1205_v47 = vpop.eup %1204  ;;  %1208 = vrcp.f32 %v649_v44 }
 0x17e   :  { %v1207_v48 = vpop.eup %1206 }
 0x17f   :  { %v650_v51 = vadd.f32 %v1207_v48, %v1205_v47 }
 0x181   :  { %v651_v54 = vrot.slane %v650_v51, 4 }
 0x183   :  { %v1209_v57 = vpop.eup %1208  ;;  %v652_v59 = vadd.f32 %v651_v54, %v650_v51 }
 0x184   :  { %v659_v60 = vmul.f32 %v1209_v57, %v1503_v8  ;;  %v660_v61 = vmul.f32 %v1209_v57, %v1505_v10 }
 0x185   :  { %v653_v62 = vrot.slane %v652_v59, 2 }
 0x186   :  { %v663_v0 = vmul.f32 %v659_v60, %v1485_v19  ;;  %v664_v1 = vmul.f32 %v660_v61, %v1487_v21 }
 0x187   :  { %v654_v3 = vadd.f32 %v653_v62, %v652_v59 }
 0x188   :  { %v667_v4 = vadd.f32 %v664_v1, %v663_v0 }
 0x189   :  { %v655_v5 = vrot.slane %v654_v3, 1 }
 0x18a   :  { %v668_v7 = vrot.slane %v667_v4, 4 }
 0x18b   :  { %v656_v6 = vadd.f32 %v655_v5, %v654_v3 }
 0x18c   :  { %v669_v8 = vadd.f32 %v668_v7, %v667_v4 }
 0x18d   :  { %1210 = vrcp.f32 %v656_v6 }
 0x18e   :  { %v670_v21 = vrot.slane %v669_v8, 2 }
 0x190   :  { %v671_v15 = vadd.f32 %v670_v21, %v669_v8 }
 0x192   :  { %v672_v17 = vrot.slane %v671_v15, 1 }
 0x193   :  { %v1211_v9 = vpop.eup %1210 }
 0x194   :  { %v661_v19 = vmul.f32 %v1211_v9, %v1205_v47  ;;  %v662_v10 = vmul.f32 %v1211_v9, %v1207_v48  ;;  %v673_v20 = vadd.f32 %v672_v17, %v671_v15 }
 0x196   :  { %v665_v12 = vmul.f32 %v661_v19, %v1491_v27  ;;  %v666_v13 = vmul.f32 %v662_v10, %v1493_v30  ;;  %v681_v24 = vpack.c.bf16 %v673_v20, %v673_v20  ;;  %v802_v30 = vlaneseq }
 0x198   :  { %v674_v14 = vadd.f32 %v666_v13, %v665_v12  ;;  %v705_v26 = vunpack.c.l.b16 %v681_v24  ;;  %v803_v32 = vshrl.u32 %v802_v30, 7  ;;  %v852_v17 = vand.u32 127, %v802_v30 }
 0x19a   :  { %v675_v16 = vrot.slane %v674_v14, 4  ;;  %1192 = vset.pattern.permute.xlu2 %v803_v32  ;;  %1194 = vset.pattern.permute.xlu0 %v803_v32  ;;  %v810_v34 = vadd.s32 8, %v803_v32 }
 0x19c   :  { %v676_v63 = vadd.f32 %v675_v16, %v674_v14  ;;  %1195 = vset.pattern.permute.xlu1 %v810_v34 }
 0x19e   :  { %v677_v18 = vrot.slane %v676_v63, 2 }
 0x1a0   :  { %v678_v58 = vadd.f32 %v677_v18, %v676_v63  ;;  %v854_v63 = vadd.s32 4294967288, %v852_v17 }
 0x1a2   :  { %v679_v22 = vrot.slane %v678_v58, 1  ;;  %806 = vperm.xlu2 %1192, %v801_v35  }
 0x1a4   :  { %v680_v23 = vadd.f32 %v679_v22, %v678_v58 }
 0x1a6   :  { %v682_v25 = vpack.c.bf16 %v680_v23, %v680_v23 }
 0x1a8   :  { %v706_v28 = vunpack.c.l.b16 %v682_v25 }
 0x1aa   :  { %v708_v29 = vsel %vm707_vm0, %v706_v28, %v705_v26  ;;  %1193 = vset.pattern.permute.xlu2 %v810_v34 }
 0x1ab   :  { %v709_v27 = vpack.c.b16 %v708_v29, %v708_v29 }
 0x1ad   :  { %767 = vmatmul.bf16.vlgmr.msrb.gmra.mxu2 %v709_v27 }
 0x1b2   :  { %812 = vperm.xlu2 %1193, %v801_v35  }
 0x1ba   :  { %1196 = vset.pattern.permute.xlu2 %v1381_v56 }
 0x1f6   :  { %v500_v36 = vpop.f32.mrf.mxu0 }
 0x1f7   :  { %v501_v41 = vadd.f32 %v500_v36, %v389_v37 }
 0x1fb   :  { %v505_v39 = vpop.f32.mrf.mxu3 }
 0x1fc   :  { %v506_v43 = vadd.f32 %v505_v39, %v389_v37  ;;  %v807_v60 = vpop.permute.xlu2 %806 }
 0x1fe   :  { %v502_v48 = vpop.f32.mrf.mxu0 }
 0x1ff   :  { %v503_v51 = vadd.f32 %v502_v48, %v389_v37 }
 0x203   :  { %v507_v50 = vpop.f32.mrf.mxu3 }
 0x204   :  { %v508_v52 = vadd.f32 %v507_v50, %v389_v37 }
 0x20c   :  { %v813_v3 = vpop.permute.xlu2 %812 }
 0x230   :  { %v768_v40 = vpop.f32.mrf.mxu2 }
 0x231   :  { %v769_v42 = vadd.f32 %v1199_v38, %v768_v40 }
 0x233   :  { %v774_v44 = vperm.slane %v769_v42, 0  ;;  %v773_v45 = vrot.slane %v769_v42, 1 }
 0x235   :  { %v778_v46 = vmul.f32 %v774_v44, %v501_v41  ;;  %v775_v47 = vperm.slane %v773_v45, 0  ;;  %v779_v53 = vmul.f32 %v774_v44, %v503_v51 }
 0x237   :  { %782 = vadd.xlane.f32.xlu0 %v778_v46  ;;  %v780_v49 = vmul.f32 %v775_v47, %v506_v43  ;;  %v781_v54 = vmul.f32 %v775_v47, %v508_v52 }
 0x238   :  { %v770_v11 = vpop.f32.mrf.mxu2 }
 0x239   :  { %786 = vadd.xlane.f32.xlu1 %v780_v49 }
 0x23f   :  { %784 = vadd.xlane.f32.xlu0 %v779_v53 }
 0x241   :  { %788 = vadd.xlane.f32.xlu1 %v781_v54 }
 0x253   :  { %819 = vperm.xlu0 %1194, %v814_v55  }
 0x25a   :  { %825 = vperm.xlu1 %1195, %v814_v55  }
 0x25b   :  { %1197 = vset.pattern.permute.xlu0 %v1381_v56 }
 0x2aa   :  { %v783_v57 = vpop.xlane.xlu0 %782 }
 0x2ab   :  { %1212 = vtanh.f32 %v783_v57 }
 0x2ac   :  { %v787_v1 = vpop.xlane.xlu1 %786 }
 0x2b1   :  { %v1213_v59 = vpop.eup %1212 }
 0x2b2   :  { %v794_v61 = vmul.f32 10.0, %v1213_v59  ;;  %v785_v62 = vpop.xlane.xlu0 %784 }
 0x2b3   :  { %1214 = vtanh.f32 %v785_v62 }
 0x2b4   :  { %v831_v0 = vsub.f32 %v794_v61, %v807_v60  ;;  %1216 = vtanh.f32 %v787_v1  ;;  %v789_v6 = vpop.xlane.xlu1 %788 }
 0x2b5   :  { %1218 = vtanh.f32 %v789_v6 }
 0x2b6   :  { %840 = vperm.xlu2 %1196, %v831_v0  }
 0x2b9   :  { %v1215_v2 = vpop.eup %1214 }
 0x2ba   :  { %v795_v4 = vmul.f32 10.0, %v1215_v2  ;;  %v1217_v7 = vpop.eup %1216 }
 0x2bb   :  { %v796_v8 = vmul.f32 10.0, %v1217_v7  ;;  %v1219_v10 = vpop.eup %1218 }
 0x2bc   :  { %v832_v5 = vsub.f32 %v795_v4, %v813_v3  ;;  %v797_v21 = vmul.f32 10.0, %v1219_v10 }
 0x2be   :  { %843 = vperm.xlu2 %1196, %v832_v5  }
 0x2c5   :  { %v820_v9 = vpop.permute.xlu0 %819 }
 0x2c6   :  { %v833_v19 = vsub.f32 %v796_v8, %v820_v9 }
 0x2c8   :  { %846 = vperm.xlu2 %1196, %v833_v19  }
 0x2cc   :  { %v826_v12 = vpop.permute.xlu1 %825 }
 0x2cd   :  { %v834_v13 = vsub.f32 %v797_v21, %v826_v12 }
 0x2d0   :  { %849 = vperm.xlu2 %1196, %v834_v13  }
 0x310   :  { %v841_v14 = vpop.permute.xlu2 %840 }
 0x311   :  { %v853_v58 = vperm.slane %v841_v14, %v852_v17 }
 0x318   :  { %v844_v15 = vpop.permute.xlu2 %843 }
 0x319   :  { %v855_v18 = vperm.slane %v844_v15, %v854_v63 }
 0x31b   :  { %v857_v24 = vsel %vm856_vm1, %v855_v18, %v853_v58 }
 0x322   :  { %v847_v16 = vpop.permute.xlu2 %846 }
 0x323   :  { %v858_v22 = vperm.slane %v847_v16, %v852_v17 }
 0x32a   :  { %v850_v20 = vpop.permute.xlu2 %849 }
 0x32b   :  { %v859_v23 = vperm.slane %v850_v20, %v854_v63 }
 0x32d   :  { %v860_v25 = vsel %vm856_vm1, %v859_v23, %v858_v22 }
 0x32e   :  { %v861_v26 = vsel %vm707_vm0, %v860_v25, %v857_v24 }
 0x32f   :  { %864 = vst.msk [vmem:[#allocation11] sm:$0x3] %vm863_vm2, %v861_v26 }
 0x330   :  { %875 = dma.vmem_to_hbm [thread:$0]  %s871_s9, 32, %s873_s13, [#allocation4]  }
 0x331   :  { %1370 = dma.done.wait [#allocation4], 32  }
 0x332   :  { %1371 = vsyncadd [#allocation4], 4294967264 }
 0x333   :  { %880 = vsyncpa [#allocation3], 1 }
 0x334   :  { %881 = vsyncpa [#allocation6], 1 }
 0x335   :  { %882 = vsyncpa [#allocation9], 1 }
 0x336   :  { %883 = vsyncpa [#allocation4], 1 }

</bundles_post_ra>
